<compile_context>
chip_gen: v7x
topology: tpu7x:2x2x1
jax: 0.10.0
libtpu: 0.0.40
codegen_flags: <defaults>
</compile_context>

<pallas_src>
import functools
import math

import jax
import jax.numpy as jnp
from jax.experimental import pallas as pl
from jax.experimental.pallas import tpu as pltpu


# ------------------------------ Pallas kernel -------------------------------

def _affine_mix_kernel(r_blk, x_ref, p_ref, y_ref):
    """y = BD @ x + bias on one (r_blk, hw_tile) activation tile.

    p_ref packs [BD | bias] as a single (r_blk, r_blk + 1) f32 parameter block
    (one resident VMEM buffer instead of several tiny ones).  BD is the
    block-diagonal expansion of the pre-composed (C, C) channel-mix matrix, so
    the entire flow chain is a single MAC sweep over r_blk rows.
    """
    h = x_ref[...].astype(jnp.float32)               # (r_blk, T), lane-dense
    p = p_ref[...].astype(jnp.float32)               # (r_blk, r_blk + 1)
    if r_blk <= 16:
        # Tiny channel mix: unrolled VPU broadcast-MACs.  Keep it off the MXU
        # (a (T, r_blk)@(r_blk, r_blk) matmul is a few % utilized and adds
        # result-FIFO drain latency); VPU is pure filler under the DMA roofline.
        acc = p[:, 0:1] * h[0:1, :]
        for k in range(1, r_blk):                    # static unroll, r_blk small
            acc = acc + p[:, k:k + 1] * h[k:k + 1, :]
    else:
        # Larger channel counts: hand the mix to the MXU instead of a long unroll.
        acc = jnp.dot(p[:, :r_blk], h, preferred_element_type=jnp.float32)
    acc = acc + p[:, r_blk:r_blk + 1]                # composed bias
    y_ref[...] = acc.astype(y_ref.dtype)


# ------------------------------ tiling helpers -------------------------------

_SUBLANE = 8  # f32 sublane tile


def _row_block(n, c):
    """Rows per block = (whole samples) * C.  Prefer the smallest multiple of
    the sublane tile (8) that divides N*C, so vregs/DMAs carry 8/8 useful
    sublanes and the MAC unroll stays short.  Fall back to the full row extent
    (exempt from the 8-divisibility rule) when no such block exists."""
    rows = n * c
    if rows % _SUBLANE == 0:
        step = (c * _SUBLANE) // math.gcd(c, _SUBLANE)   # lcm(C, 8): whole samples
        for r in range(step, rows + 1, step):
            if rows % r == 0:
                return r
    return rows


def _hw_block(hw, r_blk, itemsize, max_block_bytes=2 << 20):
    """Lane tile: a multiple of 128 (or the full extent when hw <= 128).  Sized
    against PADDED bytes so double-buffered in+out stays ~8 MiB -- comfortably
    under every generation's default scoped VMEM (16 MiB v5e, 32 MiB v6e/v7x).
    If the whole hw axis would fit one block, split it in two so v7x's two
    TensorCores both get grid steps to shard."""
    if hw <= 128:
        return hw
    pad_rows = -(-r_blk // _SUBLANE) * _SUBLANE
    lane_cap = max(128, (max_block_bytes // (pad_rows * itemsize)) // 128 * 128)
    tile = min(lane_cap, pl.cdiv(hw, 128) * 128)
    if pl.cdiv(hw, tile) < 2:
        tile = max(128, pl.cdiv(pl.cdiv(hw, 2), 128) * 128)
    return tile


# ------------------------------ chain composition ----------------------------

def _compose_ops(ops, c):
    """Fold a chain of channel-affine ops into one (A, b) with  y = A x + b.
    ops entries: ("affine", scale(C,1), shift(C,1))  ->  y = scale*x + shift
                 ("conv",   M(C,C))                  ->  y = M @ x
    Parameter-only math; done in plain JAX at full precision."""
    hi = jax.lax.Precision.HIGHEST
    a = jnp.eye(c, dtype=jnp.float32)
    b = jnp.zeros((c, 1), jnp.float32)
    for op in ops:
        if op[0] == "affine":
            scale, shift = op[1], op[2]
            a = scale * a                             # diag(scale) @ A
            b = scale * b + shift
        else:                                         # "conv"
            m = op[1]
            a = jnp.dot(m, a, precision=hi)
            b = jnp.dot(m, b, precision=hi)
    return a, b


# ------------------------------ fused driver ---------------------------------

def _run_composed_flow(x, a, b, *, max_block_bytes=2 << 20):
    """Apply the composed channel-affine map y = A x + b to x (N, C, H, W) with
    a single pallas_call over a padding-free flat (N*C, H*W) layout."""
    n, c, h, w = x.shape
    hw = h * w
    rows = n * c
    itemsize = jnp.dtype(x.dtype).itemsize

    r_blk = _row_block(n, c)
    hw_blk = _hw_block(hw, r_blk, itemsize, max_block_bytes)
    grid = (pl.cdiv(rows, r_blk), pl.cdiv(hw, hw_blk))

    # Block-diagonal expansion of A + tiled bias, packed into ONE parameter
    # block: row s*C + c of the flat layout is (sample s, channel c), and blocks
    # always start at a multiple of C, so the same BD/bias serve every block.
    n_blk = r_blk // c
    bd = jnp.kron(jnp.eye(n_blk, dtype=jnp.float32), a)     # (r_blk, r_blk)
    bias = jnp.tile(b, (n_blk, 1))                           # (r_blk, 1)
    params = jnp.concatenate([bd, bias], axis=1)             # (r_blk, r_blk + 1)

    x2 = x.reshape(rows, hw)          # free: NCHW is contiguous as (N*C, H*W)

    cost = pl.CostEstimate(
        flops=int(2 * n * hw * c * c + 2 * n * hw * c),
        transcendentals=0,
        bytes_accessed=int(2 * rows * hw * itemsize + params.size * 4),
    )

    y2 = pl.pallas_call(
        functools.partial(_affine_mix_kernel, r_blk),
        out_shape=jax.ShapeDtypeStruct((rows, hw), x.dtype),
        grid=grid,
        in_specs=[
            pl.BlockSpec((r_blk, hw_blk), lambda i, j: (i, j)),
            pl.BlockSpec(params.shape, lambda i, j: (0, 0)),   # resident params
        ],
        out_specs=pl.BlockSpec((r_blk, hw_blk), lambda i, j: (i, j)),
        compiler_params=pltpu.CompilerParams(
            dimension_semantics=("parallel", "parallel")
        ),
        cost_estimate=cost,
    )(x2, params)
    return y2.reshape(n, c, h, w)


# ------------------------------ Flow blocks ----------------------------------

class ActNorm:
    """Per-channel affine flow. forward: y = (x + b) * exp(s); reverse inverts."""

    def __init__(self, num_channels, key):
        k1, k2 = jax.random.split(key)
        # TODO(synk): standard Glow ActNorm is data-dependent-initialized; random
        # parameter init keeps this script self-contained.
        self.bias = 0.1 * jax.random.normal(k1, (num_channels, 1), jnp.float32)
        self.log_scale = 0.1 * jax.random.normal(k2, (num_channels, 1), jnp.float32)

    def fused_ops(self, reverse=False):
        if not reverse:
            scale = jnp.exp(self.log_scale)          # EUP work hoisted out of kernel
            shift = self.bias * scale                # (x + b) * s == x*s + b*s
        else:
            scale = jnp.exp(-self.log_scale)         # x = y*exp(-s) - b
            shift = -self.bias
        return [("affine", scale, shift)]

    def log_det(self, hw, reverse=False):
        ld = jnp.float32(hw) * jnp.sum(self.log_scale)
        return -ld if reverse else ld

    def __call__(self, x, reverse=False, **kwargs):
        n, c, h, w = x.shape
        a, b = _compose_ops(self.fused_ops(reverse), c)
        y = _run_composed_flow(x, a, b)
        return (y, jnp.broadcast_to(self.log_det(h * w, reverse), (n,)))


class Inv1x1Conv:
    """Invertible 1x1 convolution flow."""

    def __init__(self, num_channels, key):
        q, _ = jnp.linalg.qr(
            jax.random.normal(key, (num_channels, num_channels), jnp.float32))
        self.weight = q                              # (C, C), orthogonal-ish init

    def fused_ops(self, reverse=False):
        # TODO(synk): inv/slogdet of the tiny CxC parameter matrix have no Pallas
        # equivalent; they are parameter-only and stay in plain JAX.
        m = self.weight if not reverse else jnp.linalg.inv(self.weight)
        return [("conv", m)]

    def log_det(self, hw, reverse=False):
        _, logabsdet = jnp.linalg.slogdet(self.weight)
        ld = jnp.float32(hw) * logabsdet
        return -ld if reverse else ld

    def __call__(self, x, reverse=False, **kwargs):
        n, c, h, w = x.shape
        a, b = _compose_ops(self.fused_ops(reverse), c)
        y = _run_composed_flow(x, a, b)
        return (y, jnp.broadcast_to(self.log_det(h * w, reverse), (n,)))


# ------------------------------ FlowSequential --------------------------------

class FlowSequential:
    """Mirrors PyTorch FlowSequential.forward semantics; the whole block chain is
    pre-composed into one channel-affine map and run as a single Pallas kernel.
    Per-block log-dets are parameter-only and accumulated exactly like the
    reference loop."""

    def __init__(self, *flow_models):
        self.flow_models = list(flow_models)

    def __call__(self, x, reverse=False, **kwargs):
        n, c, h, w = x.shape
        hw = h * w
        blocks = self.flow_models if not reverse else self.flow_models[::-1]

        log_det = jnp.zeros((1,), jnp.float32)       # torch.tensor([0]) analogue
        ops = []
        for model in blocks:
            ops.extend(model.fused_ops(reverse=reverse))
            log_det = log_det + jnp.broadcast_to(
                model.log_det(hw, reverse=reverse), (n,))

        # Pre-compose the entire chain into one (C,C) + (C,1); kernel body is
        # O(1) in chain depth.
        a, b = _compose_ops(ops, c)
        y = _run_composed_flow(x, a, b)              # one fused pallas_call
        return (y, log_det)


# --------------------------------- main ---------------------------------------

if __name__ == "__main__":
    key = jax.random.PRNGKey(0)
    kx, k1, k2, k3 = jax.random.split(key, 4)

    # NCHW input, matching the PyTorch convention
    x = jax.random.normal(kx, (2, 4, 16, 16), jnp.float32)

    model = FlowSequential(
        ActNorm(4, k1),
        Inv1x1Conv(4, k2),
        ActNorm(4, k3),
    )

    y, log_det = model(x, reverse=False)
    jax.block_until_ready((y, log_det))

    # Plain-JAX reference of the same forward chain (correctness check).
    def _ref_forward(x):
        a1, conv, a2 = model.flow_models
        r = lambda p: p.reshape(1, -1, 1, 1)
        h = (x + r(a1.bias)) * jnp.exp(r(a1.log_scale))
        h = jnp.einsum("ck,nkhw->nchw", conv.weight, h,
                       precision=jax.lax.Precision.HIGHEST)
        h = (h + r(a2.bias)) * jnp.exp(r(a2.log_scale))
        hw = x.shape[2] * x.shape[3]
        ld = hw * (jnp.sum(a1.log_scale) + jnp.sum(a2.log_scale)
                   + jnp.linalg.slogdet(conv.weight)[1])
        return h, jnp.broadcast_to(ld, (x.shape[0],))

    y_ref, ld_ref = _ref_forward(x)

    assert y.shape == x.shape, y.shape
    assert log_det.shape == (2,), log_det.shape
    assert jnp.all(jnp.isfinite(y)) and jnp.all(jnp.isfinite(log_det))
    assert jnp.allclose(y, y_ref, rtol=1e-4, atol=1e-4), \
        float(jnp.max(jnp.abs(y - y_ref)))
    assert jnp.allclose(log_det, ld_ref, rtol=1e-4, atol=1e-4)

    print("KERNEL_OK")
</pallas_src>

<mosaic_0001>
module attributes {stable_mosaic.version = 11 : i64} {
  func.func @_affine_mix_kernel(%arg0: i32, %arg1: i32, %arg2: memref<8x128xf32, #tpu.memory_space<vmem>>, %arg3: memref<8x9xf32, #tpu.memory_space<vmem>>, %arg4: memref<8x128xf32, #tpu.memory_space<vmem>>) attributes {dimension_semantics = [#tpu.dimension_semantics<parallel>, #tpu.dimension_semantics<parallel>], iteration_bounds = array<i64: 1, 2>, scalar_prefetch = 0 : i64, scratch_operands = 0 : i64, tpu.core_type = #tpu.core_type<tc>, window_params = [{transform_indices = @transform_0, window_bounds = array<i64: 8, 128>}, {pipeline_mode = #tpu.pipeline_mode<synchronous>, transform_indices = @transform_1, window_bounds = array<i64: 8, 9>}, {transform_indices = @transform_2, window_bounds = array<i64: 8, 128>}]} {
    %c0 = arith.constant 0 : index
    %c0_0 = arith.constant 0 : index
    %0 = vector.load %arg2[%c0, %c0_0] : memref<8x128xf32, #tpu.memory_space<vmem>>, vector<8x128xf32>
    %c0_1 = arith.constant 0 : index
    %c0_2 = arith.constant 0 : index
    %1 = vector.load %arg3[%c0_1, %c0_2] : memref<8x9xf32, #tpu.memory_space<vmem>>, vector<8x9xf32>
    %2 = vector.extract_strided_slice %1 {offsets = [0, 0], sizes = [8, 1], strides = [1, 1]} : vector<8x9xf32> to vector<8x1xf32>
    %3 = vector.extract_strided_slice %0 {offsets = [0, 0], sizes = [1, 128], strides = [1, 1]} : vector<8x128xf32> to vector<1x128xf32>
    %4 = vector.broadcast %2 : vector<8x1xf32> to vector<8x128xf32>
    %5 = vector.broadcast %3 : vector<1x128xf32> to vector<8x128xf32>
    %6 = arith.mulf %4, %5 : vector<8x128xf32>
    %7 = vector.extract_strided_slice %1 {offsets = [0, 1], sizes = [8, 1], strides = [1, 1]} : vector<8x9xf32> to vector<8x1xf32>
    %8 = vector.extract_strided_slice %0 {offsets = [1, 0], sizes = [1, 128], strides = [1, 1]} : vector<8x128xf32> to vector<1x128xf32>
    %9 = vector.broadcast %7 : vector<8x1xf32> to vector<8x128xf32>
    %10 = vector.broadcast %8 : vector<1x128xf32> to vector<8x128xf32>
    %11 = arith.mulf %9, %10 : vector<8x128xf32>
    %12 = arith.addf %6, %11 : vector<8x128xf32>
    %13 = vector.extract_strided_slice %1 {offsets = [0, 2], sizes = [8, 1], strides = [1, 1]} : vector<8x9xf32> to vector<8x1xf32>
    %14 = vector.extract_strided_slice %0 {offsets = [2, 0], sizes = [1, 128], strides = [1, 1]} : vector<8x128xf32> to vector<1x128xf32>
    %15 = vector.broadcast %13 : vector<8x1xf32> to vector<8x128xf32>
    %16 = vector.broadcast %14 : vector<1x128xf32> to vector<8x128xf32>
    %17 = arith.mulf %15, %16 : vector<8x128xf32>
    %18 = arith.addf %12, %17 : vector<8x128xf32>
    %19 = vector.extract_strided_slice %1 {offsets = [0, 3], sizes = [8, 1], strides = [1, 1]} : vector<8x9xf32> to vector<8x1xf32>
    %20 = vector.extract_strided_slice %0 {offsets = [3, 0], sizes = [1, 128], strides = [1, 1]} : vector<8x128xf32> to vector<1x128xf32>
    %21 = vector.broadcast %19 : vector<8x1xf32> to vector<8x128xf32>
    %22 = vector.broadcast %20 : vector<1x128xf32> to vector<8x128xf32>
    %23 = arith.mulf %21, %22 : vector<8x128xf32>
    %24 = arith.addf %18, %23 : vector<8x128xf32>
    %25 = vector.extract_strided_slice %1 {offsets = [0, 4], sizes = [8, 1], strides = [1, 1]} : vector<8x9xf32> to vector<8x1xf32>
    %26 = vector.extract_strided_slice %0 {offsets = [4, 0], sizes = [1, 128], strides = [1, 1]} : vector<8x128xf32> to vector<1x128xf32>
    %27 = vector.broadcast %25 : vector<8x1xf32> to vector<8x128xf32>
    %28 = vector.broadcast %26 : vector<1x128xf32> to vector<8x128xf32>
    %29 = arith.mulf %27, %28 : vector<8x128xf32>
    %30 = arith.addf %24, %29 : vector<8x128xf32>
    %31 = vector.extract_strided_slice %1 {offsets = [0, 5], sizes = [8, 1], strides = [1, 1]} : vector<8x9xf32> to vector<8x1xf32>
    %32 = vector.extract_strided_slice %0 {offsets = [5, 0], sizes = [1, 128], strides = [1, 1]} : vector<8x128xf32> to vector<1x128xf32>
    %33 = vector.broadcast %31 : vector<8x1xf32> to vector<8x128xf32>
    %34 = vector.broadcast %32 : vector<1x128xf32> to vector<8x128xf32>
    %35 = arith.mulf %33, %34 : vector<8x128xf32>
    %36 = arith.addf %30, %35 : vector<8x128xf32>
    %37 = vector.extract_strided_slice %1 {offsets = [0, 6], sizes = [8, 1], strides = [1, 1]} : vector<8x9xf32> to vector<8x1xf32>
    %38 = vector.extract_strided_slice %0 {offsets = [6, 0], sizes = [1, 128], strides = [1, 1]} : vector<8x128xf32> to vector<1x128xf32>
    %39 = vector.broadcast %37 : vector<8x1xf32> to vector<8x128xf32>
    %40 = vector.broadcast %38 : vector<1x128xf32> to vector<8x128xf32>
    %41 = arith.mulf %39, %40 : vector<8x128xf32>
    %42 = arith.addf %36, %41 : vector<8x128xf32>
    %43 = vector.extract_strided_slice %1 {offsets = [0, 7], sizes = [8, 1], strides = [1, 1]} : vector<8x9xf32> to vector<8x1xf32>
    %44 = vector.extract_strided_slice %0 {offsets = [7, 0], sizes = [1, 128], strides = [1, 1]} : vector<8x128xf32> to vector<1x128xf32>
    %45 = vector.broadcast %43 : vector<8x1xf32> to vector<8x128xf32>
    %46 = vector.broadcast %44 : vector<1x128xf32> to vector<8x128xf32>
    %47 = arith.mulf %45, %46 : vector<8x128xf32>
    %48 = arith.addf %42, %47 : vector<8x128xf32>
    %49 = vector.extract_strided_slice %1 {offsets = [0, 8], sizes = [8, 1], strides = [1, 1]} : vector<8x9xf32> to vector<8x1xf32>
    %50 = vector.broadcast %49 : vector<8x1xf32> to vector<8x128xf32>
    %51 = arith.addf %48, %50 : vector<8x128xf32>
    %c0_3 = arith.constant 0 : index
    %c0_4 = arith.constant 0 : index
    %52 = vector.load %arg4[%c0_3, %c0_4] : memref<8x128xf32, #tpu.memory_space<vmem>>, vector<8x128xf32>
    tpu.vector_store %arg4[%c0_3, %c0_4], %51 {strides = array<i32>} : memref<8x128xf32, #tpu.memory_space<vmem>>, vector<8x128xf32>,
    return
  }
  func.func @transform_0(%arg0: i32, %arg1: i32) -> (i32, i32) {
    %c0_i32 = arith.constant 0 : i32
    return %arg0, %arg1 : i32, i32
  }
  func.func @transform_1(%arg0: i32, %arg1: i32) -> (i32, i32) {
    %c0_i32 = arith.constant 0 : i32
    %c0_i32_0 = arith.constant 0 : i32
    %c0_i32_1 = arith.constant 0 : i32
    return %c0_i32, %c0_i32_0 : i32, i32
  }
  func.func @transform_2(%arg0: i32, %arg1: i32) -> (i32, i32) {
    %c0_i32 = arith.constant 0 : i32
    return %arg0, %arg1 : i32, i32
  }
}

</mosaic_0001>

<bundles_post_ra>
// kernel: tpu_custom_call.1
= control target key start
LH: loop header
LB: loop body
LE: loop exit
PB: predicated region body
PF: predicated region fallthrough
CT: control target
= control target key end

     0   :  { %7 = vsyncpa [#allocation3], 0  ;;  %s888_s0 = inlined_call_operand.hbm [shape: f32[8,256], index: 0, kind: input, shape index: {}]   ;;  %s889_s1 = inlined_call_operand.hbm [shape: f32[8,9], index: 1, kind: input, shape index: {}]   ;;  %s890_s2 = inlined_call_operand.hbm [shape: f32[8,256], index: 2, kind: output, shape index: {}]  }
   0x1   :  { %9 = vsyncpa [#allocation3 + $0x1], 0 }
   0x2   :  { %10 = vsyncpa [#allocation6], 0 }
   0x3   :  { %11 = vsyncpa [#allocation4], 0 }
   0x4   :  { %13 = vsyncpa [#allocation4 + $0x1], 0  ;;  %s665_s9 = smov 0   ;;  %s667_s10 = smov 0  }
   0x5   :  { %s669_s11 = smov 0   ;;  %s671_s12 = smov 0  }
   0x6   :  { %s673_s13 = smov 0   ;;  %s675_s14 = smov 0  }
   0x7 LB: > { %s386_s15 = sadd.s32 4294967295, %s636_s14   ;;  %s387_s16 = sadd.s32 4294967294, %s636_s14   ;;  %s636_s14 = sphi %s675_s14, %s19_s14   ;;  %s632_s13 = sphi %s673_s13, %s915_s13   ;;  %s628_s12 = sphi %s671_s12, %s914_s12   ;;  %s624_s11 = sphi %s669_s11, %s913_s11   ;;  %s620_s10 = sphi %s667_s10, %s912_s10   ;;  %s616_s9 = sphi %s665_s9, %s911_s9  }
   0x8   : > { %p53_p0 = scmp.ne.s32.totalorder %s620_s10, %s616_s9  ;;  %p699_p1 = scmp.eq.s32.totalorder %s386_s15, 0 }
   0x9   : > { %p703_p2 = scmp.eq.s32.totalorder %s386_s15, 1  ;;  %p106_p3 = scmp.eq.s32.totalorder %s387_s16, 1 }
   0xa   : > { %s895_s17 = scalar_select %p699_p1, 1, 0 }
   0xb   : > { %s896_s18 = scalar_select %p703_p2, 1, 0 }
   0xc   : > { %p709_p4 = por %p699_p1, %p53_p0  ;;  %p388_p5 = scmp.ge.s32.totalorder %s636_s14, 1 }
   0xd   : > { %p714_p6 = por %p106_p3, %p53_p0  ;;  %p113_p7 = scmp.lt.s32.totalorder %s636_s14, 3 }
   0xe   : > { %s897_s19 = scalar_select %p709_p4, 1, 0 }
   0xf   : > { %s898_s20 = scalar_select %p714_p6, 1, 0 }
  0x10   : > { %p719_p8 = pnand %p388_p5, %p113_p7  ;;  %s638_s22 = smov [#allocation5]  }
  0x11   : > { %s126_s23 = sshll.u32 %s638_s22, 4  ;;  %s28_s25 = sadd.s32 1, %s632_s13  ;;  %s127_s23 = int_to_ptr.vmem [resolvable:$true] %s126_s23 }
  0x12   : > { %s899_s21 = scalar_select %p719_p8, 1, 0 }
  0x13   : > { %p409_p10 = pneg %p719_p8  ;;  %s40_s26 = sadd.s32 1, %s624_s11 }
  0x14   : > { %p734_p12 = scmp.ge.s32.totalorder %s28_s25, 2  ;;  %s492_s30 = scalar_lea.hbm %s889_s1, 128 }
  0x15   : > { %p728_p11 = pnand %p409_p10, %p699_p1  ;;  %p493_p13 = scmp.ne.s32.totalorder %s889_s1, %s492_s30 }
  0x16   : > { %s901_s27 = scalar_select %p734_p12, 1, 0 }
  0x17   : > { %p494_p0 = pneg %p728_p11  ;;  %p499_p7 = scmp.lt.u32.totalorder %s492_s30, %s889_s1 }
  0x19   : > { %p495_p3 = pnand %p494_p0, %p493_p13 }
  0x1b   : > { %p496_p5 = pneg %p495_p3 }
  0x1d   : > { %p501_p10 = pnand %p499_p7, %p496_p5 }
  0x1f   : > { %504 = shalt.err (!%p501_p10)
}
  0x20   : > { %s505_s7 = scalar_lea.vmem %s127_s23, 128  ;;  %p513_p4 = scmp.lt.s32.totalorder %s127_s23, %s127_s23 }
  0x21   : > { %p506_p9 = scmp.ne.s32.totalorder %s127_s23, %s505_s7  ;;  %p514_p8 = scmp.lt.s32.totalorder %s505_s7, %s505_s7 }
  0x23   : > { %p508_p6 = pnand %p506_p9, %p494_p0  ;;  %p515_p2 = por %p514_p8, %p513_p4 }
  0x25   : > { %p509_p1 = pneg %p508_p6 }
  0x27   : > { %p516_p12 = pnand %p515_p2, %p509_p1 }
  0x29   : > { %519 = shalt.err (!%p516_p12)
}
  0x2a   : > { %412 = dma.hbm_to_vmem [thread:$0]  (!%p728_p11), %s889_s1, 128, %s127_s23, [#allocation6]  }
  0x2b   : > { %p902_p4 = scmp.ne.s32.totalorder %s901_s27, 0  ;;  %p47_p1 = scmp.ne.s32.totalorder %s624_s11, %s620_s10 }
  0x2c   : > { %p48_p2 = scmp.eq.s32.totalorder %s636_s14, 0  ;;  %p422_p6 = scmp.lt.s32.totalorder %s636_s14, 2 }
  0x2d   : > { %s917_s25 = smov (%p902_p4, %s28_s25), 0  ;;  %p903_p12 = scmp.ne.s32.totalorder %s896_s18, 0 }
  0x2e   : > { %s36_s16 = ssub.s32 %s632_s13, %s917_s25  ;;  %p49_p9 = por %p48_p2, %p47_p1 }
  0x2f   : > { %p38_p8 = scmp.eq.s32.totalorder %s36_s16, 0  ;;  %p766_p13 = por %p903_p12, %p47_p1 }
  0x30   : > { %s137_s24 = sand.u32 1, %s624_s11   ;;  %s392_s27 = sshll.u32 %s632_s13, 7 }
  0x31   : > { %s774_s28 = scalar_select %p38_p8, %s624_s11, %s40_s26  }
  0x32   : > { %s391_s23 = sshll.u32 %s137_s24, 3  ;;  %s780_s3 = scalar_lea.hbm %s888_s0, %s392_s27 }
  0x33   : > { %s141_s18 = scalar_lea.vmem [#allocation2], %s391_s23  ;;  %p784_p11 = pnand %p422_p6, %p49_p9 }
  0x34   : > { %s150_s4 = sshll.u32 %s141_s18, 4  ;;  %s138_s26 = scalar_lea.sflag [#allocation3], %s137_s24  ;;  %s782_s4 = int_to_ptr.vmem [resolvable:$true] %s150_s4 }
  0x35   : > { %s520_s6 = scalar_lea.hbm %s780_s3, 128  ;;  %p522_p3 = pneg %p784_p11 }
  0x36   : > { %p521_p0 = scmp.ne.s32.totalorder %s780_s3, %s520_s6  ;;  %s525_s15 = scalar_lea.hbm %s888_s0, 256 }
  0x37   : > { %p526_p10 = scmp.lt.u32.totalorder %s780_s3, %s888_s0  ;;  %p527_p4 = scmp.lt.u32.totalorder %s525_s15, %s520_s6 }
  0x38   : > { %p523_p5 = pnand %p522_p3, %p521_p0  ;;  %p529_p2 = scmp.lt.u32.totalorder %s520_s6, %s780_s3 }
  0x39   : > { %p528_p1 = por %p527_p4, %p526_p10 }
  0x3a   : > { %p524_p7 = pneg %p523_p5 }
  0x3b   : > { %p530_p6 = por %p529_p2, %p528_p1 }
  0x3d   : > { %p531_p8 = pnand %p530_p6, %p524_p7 }
  0x3f   : > { %534 = shalt.err (!%p531_p8)
}
  0x40   : > { %s535_s24 = scalar_lea.vmem %s782_s4, 128  ;;  %s639_s27 = smov [#allocation2]  }
  0x41   : > { %p536_p9 = scmp.ne.s32.totalorder %s782_s4, %s535_s24  ;;  %s540_s29 = sshll.u32 %s639_s27, 4  ;;  %s541_s29 = int_to_ptr.vmem [resolvable:$false] %s540_s29 }
  0x42   : > { %s542_s30 = scalar_lea.vmem %s541_s29, 256  ;;  %p543_p5 = scmp.lt.s32.totalorder %s782_s4, %s541_s29 }
  0x43   : > { %p538_p12 = pnand %p536_p9, %p522_p3  ;;  %p544_p10 = scmp.lt.s32.totalorder %s542_s30, %s535_s24 }
  0x45   : > { %p539_p0 = pneg %p538_p12  ;;  %p545_p4 = por %p544_p10, %p543_p5 }
  0x47   : > { %p546_p1 = pnand %p545_p4, %p539_p0 }
  0x49   : > { %549 = shalt.err (!%p546_p1)
}
  0x4a   : > { %416 = dma.hbm_to_vmem [thread:$0]  (!%p784_p11), %s780_s3, 128, %s782_s4, %s138_s26  }
  0x4b   : > { %p906_p7 = scmp.ne.s32.totalorder %s899_s21, 0 }
  0x4c   : > { %s816_s18 = sand.u32 (!%p906_p7), 1, %s620_s10   ;;  %p907_p3 = scmp.ne.s32.totalorder (!%p906_p7), %s897_s19, 0 }
  0x4d   : > { %159 = sbr.rel (%p906_p7) target bundleno = 258 (0x102), region = 28  ;;  %s394_s6 = sshll.u32 (!%p906_p7), %s816_s18, 3 }
  0x4e   : > { %s162_s7 = scalar_lea.sflag (!%p906_p7), [#allocation3], %s816_s18  ;;  %s822_s8 = scalar_lea.vmem (!%p906_p7), [#allocation2], %s394_s6 }
  0x54   : > { %603 = dma.done.wait (%p907_p3), %s162_s7, 128  }
  0x55   : > { %605 = vsyncadd (%p907_p3), %s162_s7, 4294967168  ;;  %p908_p11 = scmp.ne.s32.totalorder %s895_s17, 0 }
  0x57   : > { %607 = dma.done.wait (%p908_p11), [#allocation6], 128  }
  0x58   : > { %609 = vsyncadd (%p908_p11), [#allocation6], 4294967168  ;;  %v640_v0 = vmov 2   ;;  %v641_v1 = vmov 0   ;;  %v191_v2 = vld [vmem:[#allocation5] sm:$0xff]  ;;  %v642_v3 = vmov 3   ;;  %v197_v10 = vlaneseq }
  0x59   : > { %485 = vset.pattern.permute.xlu1 %v640_v0  ;;  %483 = vset.pattern.permute.xlu0 %v641_v1  ;;  %v643_v4 = vmov 1   ;;  %v644_v5 = vmov 4   ;;  %v645_v6 = vmov 5   ;;  %v646_v7 = vmov 6   ;;  %v190_v17 = vld [vmem:[%s822_s8] sm:$0xff]  ;;  %s398_s17 = sshll.u32 %s628_s12, 7 }
  0x5a   : > { %213 = vperm.xlu1 %485, %v191_v2   ;;  %194 = vperm.xlu0 %483, %v191_v2   ;;  %v647_v8 = vmov 8   ;;  %v648_v9 = vmov 7   ;;  %v198_v11 = vshrl.u32 %v197_v10, 7  ;;  %s189_s19 = scalar_lea.vmem [#allocation7], %s394_s6  ;;  %s839_s5 = scalar_lea.hbm %s890_s2, %s398_s17 }
  0x5b   : > { %s294_s21 = sshll.u32 %s189_s19, 4  ;;  %s279_s26 = scalar_lea.sflag [#allocation4], %s816_s18  ;;  %s841_s21 = int_to_ptr.vmem [resolvable:$true] %s294_s21 }
  0x5c   : > { %v199_v12 = vsub.s32 0, %v198_v11  ;;  %v208_v13 = vsub.s32 1, %v198_v11  ;;  %v218_v14 = vsub.s32 2, %v198_v11  ;;  %v228_v19 = vsub.s32 3, %v198_v11  ;;  %s550_s15 = scalar_lea.vmem %s841_s21, 128  ;;  %s649_s12 = smov [#allocation7]  }
  0x5d   : > { %v238_v21 = vsub.s32 4, %v198_v11  ;;  %v248_v25 = vsub.s32 5, %v198_v11  ;;  %v258_v33 = vsub.s32 6, %v198_v11  ;;  %v268_v42 = vsub.s32 7, %v198_v11  ;;  %p551_p2 = scmp.ne.s32.totalorder %s841_s21, %s550_s15  ;;  %s554_s16 = sshll.u32 %s649_s12, 4  ;;  %s555_s16 = int_to_ptr.vmem [resolvable:$false] %s554_s16 }
  0x5e   : > { %486 = vset.pattern.permute.xlu1 %v642_v3  ;;  %484 = vset.pattern.permute.xlu0 %v643_v4  ;;  %v200_v18 = vrot.slane %v190_v17, %v199_v12  ;;  %v209_v20 = vrot.slane %v190_v17, %v208_v13  ;;  %v219_v22 = vrot.slane %v190_v17, %v218_v14  ;;  %s556_s23 = scalar_lea.vmem %s555_s16, 256  ;;  %p557_p9 = scmp.lt.s32.totalorder %s841_s21, %s555_s16 }
  0x5f   : > { %223 = vperm.xlu1 %486, %v191_v2   ;;  %203 = vperm.xlu0 %484, %v191_v2   ;;  %v229_v27 = vrot.slane %v190_v17, %v228_v19  ;;  %v239_v29 = vrot.slane %v190_v17, %v238_v21  ;;  %v249_v32 = vrot.slane %v190_v17, %v248_v25  ;;  %p552_p6 = pnand %p551_p2, %p766_p13  ;;  %p558_p12 = scmp.lt.s32.totalorder %s556_s23, %s550_s15 }
  0x60   : > { %v259_v41 = vrot.slane %v190_v17, %v258_v33  ;;  %v269_v47 = vrot.slane %v190_v17, %v268_v42 }
  0x61   : > { %p553_p8 = pneg %p552_p6  ;;  %p559_p0 = por %p558_p12, %p557_p9 }
  0x63   : > { %487 = vset.pattern.permute.xlu1 %v644_v5  ;;  %488 = vset.pattern.permute.xlu0 %v645_v6  ;;  %p560_p5 = pnand %p559_p0, %p553_p8 }
  0x64   : > { %233 = vperm.xlu1 %487, %v191_v2   ;;  %243 = vperm.xlu0 %488, %v191_v2  }
  0x68   : > { %489 = vset.pattern.permute.xlu1 %v646_v7  ;;  %491 = vset.pattern.permute.xlu0 %v647_v8 }
  0x69   : > { %253 = vperm.xlu1 %489, %v191_v2   ;;  %273 = vperm.xlu0 %491, %v191_v2  }
  0x6d   : > { %490 = vset.pattern.permute.xlu1 %v648_v9 }
  0x6e   : > { %263 = vperm.xlu1 %490, %v191_v2  }
  0xd9   : > { %v214_v15 = vpop.permute.xlu1 %213  ;;  %v195_v16 = vpop.permute.xlu0 %194 }
  0xda   : > { %v201_v26 = vmul.f32 %v200_v18, %v195_v16  ;;  %v220_v30 = vmul.f32 %v219_v22, %v214_v15 }
  0xde   : > { %v224_v23 = vpop.permute.xlu1 %223  ;;  %v204_v24 = vpop.permute.xlu0 %203 }
  0xdf   : > { %v210_v28 = vmul.f32 %v209_v20, %v204_v24  ;;  %v230_v34 = vmul.f32 %v229_v27, %v224_v23 }
  0xe1   : > { %v211_v31 = vadd.f32 %v210_v28, %v201_v26 }
  0xe3   : > { %v221_v35 = vadd.f32 %v220_v30, %v211_v31  ;;  %v234_v36 = vpop.permute.xlu1 %233  ;;  %v244_v37 = vpop.permute.xlu0 %243 }
  0xe4   : > { %v240_v38 = vmul.f32 %v239_v29, %v234_v36  ;;  %v250_v40 = vmul.f32 %v249_v32, %v244_v37 }
  0xe5   : > { %v231_v39 = vadd.f32 %v230_v34, %v221_v35 }
  0xe7   : > { %v241_v43 = vadd.f32 %v240_v38, %v231_v39 }
  0xe8   : > { %v254_v44 = vpop.permute.xlu1 %253  ;;  %v274_v51 = vpop.permute.xlu0 %273 }
  0xe9   : > { %v251_v45 = vadd.f32 %v250_v40, %v241_v43  ;;  %v260_v46 = vmul.f32 %v259_v41, %v254_v44 }
  0xeb   : > { %v261_v49 = vadd.f32 %v260_v46, %v251_v45 }
  0xed   : > { %v264_v48 = vpop.permute.xlu1 %263 }
  0xee   : > { %v270_v50 = vmul.f32 %v269_v47, %v264_v48 }
  0xf0   : > { %v271_v52 = vadd.f32 %v270_v50, %v261_v49 }
  0xf2   : > { %v276_v53 = vadd.f32 %v274_v51, %v271_v52 }
  0xf4   : > { %277 = vst [vmem:[%s189_s19] sm:$0xff] %v276_v53 }
  0xf5   : > { %563 = shalt.err (!%p560_p5)
}
  0xf6   : > { %s564_s24 = scalar_lea.hbm %s839_s5, 128  ;;  %s568_s30 = scalar_lea.hbm %s890_s2, 256 }
  0xf7   : > { %p565_p10 = scmp.ne.s32.totalorder %s839_s5, %s564_s24  ;;  %p569_p7 = scmp.lt.u32.totalorder %s839_s5, %s890_s2 }
  0xf8   : > { %p570_p3 = scmp.lt.u32.totalorder %s568_s30, %s564_s24  ;;  %p572_p2 = scmp.lt.u32.totalorder %s564_s24, %s839_s5 }
  0xf9   : > { %p566_p4 = pnand %p565_p10, %p766_p13 }
  0xfa   : > { %p571_p11 = por %p570_p3, %p569_p7 }
  0xfb   : > { %p567_p1 = pneg %p566_p4 }
  0xfc   : > { %p573_p6 = por %p572_p2, %p571_p11 }
  0xfe   : > { %p574_p8 = pnand %p573_p6, %p567_p1 }
 0x100   : > { %577 = shalt.err (!%p574_p8)
}
 0x101   : > { %407 = dma.vmem_to_hbm [thread:$0]  (%p766_p13), %s841_s21, 128, %s839_s5, %s279_s26  }
 0x102 PF: > { %s306_s7 = sand.u32 1, %s616_s9   ;;  %p909_p9 = scmp.ne.s32.totalorder %s898_s20, 0 }
 0x103   : > { %p910_p12 = scmp.ge.s32.totalorder %s636_s14, 2  ;;  %s307_s8 = scalar_lea.sflag [#allocation4], %s306_s7 }
 0x105   : > { %p418_p0 = pnand %p910_p12, %p909_p9 }
 0x107   : > { %611 = dma.done.wait (!%p418_p0), %s307_s8, 128  }
 0x108   : > { %613 = vsyncadd (!%p418_p0), %s307_s8, 4294967168  ;;  %s19_s14 = sadd.s32 1, %s636_s14   ;;  %s911_s9 = smov %s620_s10 }
 0x109   : > { %p16_p5 = scmp.ge.s32.totalorder %s19_s14, 4   ;;  %s912_s10 = smov %s624_s11 }
 0x10a   : > { %s913_s11 = smov %s774_s28  ;;  %s914_s12 = smov %s632_s13 }
 0x10b   : > { %s915_s13 = smov %s917_s25  ;;  %18 = sbr.rel (!%p16_p5) target bundleno = 7 (0x7), region = 77 }
 0x112   :  { %312 = vsyncpa [#allocation3], 1 }
 0x113   :  { %314 = vsyncpa [#allocation3 + $0x1], 1 }
 0x114   :  { %315 = vsyncpa [#allocation6], 1 }
 0x115   :  { %316 = vsyncpa [#allocation4], 1 }
 0x116   :  { %318 = vsyncpa [#allocation4 + $0x1], 1 }

</bundles_post_ra>
